<compile_context>
chip_gen: v7x
topology: tpu7x:2x2x1
jax: 0.10.0
libtpu: 0.0.40
codegen_flags: <defaults>
</compile_context>

<pallas_src>
import functools
import math

import jax
import jax.numpy as jnp
from jax.experimental import pallas as pl
from jax.experimental.pallas import tpu as pltpu


def _round_up(x, m):
    return (x + m - 1) // m * m


def _vmem_limit_bytes():
    """Generation-aware scoped-VMEM limit (v7x has only 64 MiB physical per TC)."""
    cap = 64 * 1024 * 1024
    try:
        cap = int(getattr(pltpu.get_tpu_info(), "vmem_capacity_bytes", cap))
    except Exception:
        pass
    return min(96 * 1024 * 1024, (cap * 3) // 4)


# ----------------------------- Pallas kernel ---------------------------------

def _ff_kernel(x_ref, w1_ref, b1_ref, w2_ref, b2_ref, o_ref):
    # x_ref : (tm, D)      f32   activation row-block
    # w1_ref: (D, Hpad)    bf16  Linear1 weight, zero-padded to lane-dense Hpad
    # b1_ref: (1, Hpad)    f32
    # w2_ref: (Hpad, Dpad) bf16  Linear2 weight, zero-padded rows/cols
    # b2_ref: (1, Dpad)    f32
    # o_ref : (tm, Dpad)   f32   lane-dense output (sliced back to D outside)
    x = x_ref[...].astype(w1_ref.dtype)                       # in-register bf16 cast
    h = jnp.dot(x, w1_ref[...], preferred_element_type=jnp.float32) + b1_ref[...]
    h = h * jax.lax.logistic(h)                               # SiLU via EUP logistic
    # Dropout(p=0.0) is an inference no-op.
    y = jnp.dot(h.astype(w2_ref.dtype), w2_ref[...],
                preferred_element_type=jnp.float32) + b2_ref[...]
    o_ref[...] = y


# ----------------------------- wrapper ----------------------------------------

@functools.partial(jax.jit, static_argnames=("out_dim", "tile_m"))
def _ff_forward_2d(x2d, w1p, b1p, w2p, b2p, *, out_dim, tile_m=1024):
    M, D = x2d.shape
    Hpad = w1p.shape[1]
    Dpad = w2p.shape[1]
    tm = min(tile_m, _round_up(M, 8))
    grid = (pl.cdiv(M, tm),)
    out = pl.pallas_call(
        _ff_kernel,
        out_shape=jax.ShapeDtypeStruct((M, Dpad), jnp.float32),
        grid=grid,
        in_specs=[
            pl.BlockSpec((tm, D), lambda i: (i, 0)),
            pl.BlockSpec((D, Hpad), lambda i: (0, 0)),
            pl.BlockSpec((1, Hpad), lambda i: (0, 0)),
            pl.BlockSpec((Hpad, Dpad), lambda i: (0, 0)),
            pl.BlockSpec((1, Dpad), lambda i: (0, 0)),
        ],
        out_specs=pl.BlockSpec((tm, Dpad), lambda i: (i, 0)),
        compiler_params=pltpu.CompilerParams(
            dimension_semantics=("parallel",),
            vmem_limit_bytes=_vmem_limit_bytes(),
        ),
    )(x2d, w1p, b1p, w2p, b2p)
    return out[:, :out_dim]


class FeedForward:
    """Pallas-TPU counterpart of the PyTorch FeedForward module (inference mode)."""

    def __init__(self, dim, hidden_dim, dropout=0.0, *, key):
        # TODO(synk): training-mode dropout (p > 0) RNG masking is not implemented;
        # the module default p=0.0 is an inference no-op.
        assert dropout == 0.0
        hidden = hidden_dim // 2 if dim in (80, 96) else hidden_dim
        k1, k2, k3, k4 = jax.random.split(key, 4)
        bound1 = 1.0 / math.sqrt(dim)
        bound2 = 1.0 / math.sqrt(hidden)
        # PyTorch nn.Linear default init: U(-1/sqrt(fan_in), +1/sqrt(fan_in)).
        self.w1 = jax.random.uniform(k1, (dim, hidden), jnp.float32, -bound1, bound1)
        self.b1 = jax.random.uniform(k2, (hidden,), jnp.float32, -bound1, bound1)
        self.w2 = jax.random.uniform(k3, (hidden, dim), jnp.float32, -bound2, bound2)
        self.b2 = jax.random.uniform(k4, (dim,), jnp.float32, -bound2, bound2)
        self.dim, self.hidden = dim, hidden

        # One-time padding to lane-dense (128-multiple) feature widths + bf16 weights.
        Hpad = _round_up(hidden, 128)
        Dpad = _round_up(dim, 128)
        self.w1p = jnp.pad(self.w1, ((0, 0), (0, Hpad - hidden))).astype(jnp.bfloat16)
        self.b1p = jnp.pad(self.b1, (0, Hpad - hidden)).reshape(1, Hpad)
        self.w2p = jnp.pad(self.w2, ((0, Hpad - hidden), (0, Dpad - dim))).astype(jnp.bfloat16)
        self.b2p = jnp.pad(self.b2, (0, Dpad - dim)).reshape(1, Dpad)

    def __call__(self, x):
        lead = x.shape[:-1]
        x2d = x.reshape(-1, self.dim).astype(jnp.float32)
        y = _ff_forward_2d(x2d, self.w1p, self.b1p, self.w2p, self.b2p,
                           out_dim=self.dim)
        return y.reshape(*lead, self.dim)

    def reference(self, x):
        # Pure-JAX f32 reference for correctness checking.
        x2d = x.reshape(-1, self.dim).astype(jnp.float32)
        h = x2d @ self.w1 + self.b1
        h = h * jax.nn.sigmoid(h)
        y = h @ self.w2 + self.b2
        return y.reshape(*x.shape[:-1], self.dim)


if __name__ == "__main__":
    root = jax.random.PRNGKey(0)
    cases = [
        # (dim, hidden_dim, input shape); hidden_dim is halved internally for dim 80/96
        (64, 128, (2, 4, 16, 64)),
        (80, 320, (2, 8, 80)),
        (96, 384, (1, 3000, 96)),   # exercises multi-step grid + partial last block
    ]
    for idx, (dim, hidden_dim, shape) in enumerate(cases):
        kparam, kx = jax.random.split(jax.random.fold_in(root, idx))
        ff = FeedForward(dim, hidden_dim, 0.0, key=kparam)
        x = jax.random.normal(kx, shape, dtype=jnp.float32)
        out = jax.block_until_ready(ff(x))
        ref = ff.reference(x)
        assert out.shape == shape, (out.shape, shape)
        assert bool(jnp.all(jnp.isfinite(out)))
        assert bool(jnp.allclose(out, ref, rtol=3e-2, atol=3e-2)), (
            f"mismatch dim={dim}: max abs err "
            f"{float(jnp.max(jnp.abs(out - ref)))}")
    print("KERNEL_OK")
</pallas_src>

<mosaic_0001>
module attributes {stable_mosaic.version = 11 : i64} {
  func.func @_ff_kernel(%arg0: i32, %arg1: memref<128x64xf32, #tpu.memory_space<vmem>>, %arg2: memref<64x128xbf16, #tpu.memory_space<vmem>>, %arg3: memref<1x128xf32, #tpu.memory_space<vmem>>, %arg4: memref<128x128xbf16, #tpu.memory_space<vmem>>, %arg5: memref<1x128xf32, #tpu.memory_space<vmem>>, %arg6: memref<128x128xf32, #tpu.memory_space<vmem>>) attributes {dimension_semantics = [#tpu.dimension_semantics<parallel>], iteration_bounds = array<i64: 1>, scalar_prefetch = 0 : i64, scratch_operands = 0 : i64, tpu.core_type = #tpu.core_type<tc>, window_params = [{transform_indices = @transform_0, window_bounds = array<i64: 128, 64>}, {pipeline_mode = #tpu.pipeline_mode<synchronous>, transform_indices = @transform_1, window_bounds = array<i64: 64, 128>}, {pipeline_mode = #tpu.pipeline_mode<synchronous>, transform_indices = @transform_2, window_bounds = array<i64: 1, 128>}, {pipeline_mode = #tpu.pipeline_mode<synchronous>, transform_indices = @transform_3, window_bounds = array<i64: 128, 128>}, {pipeline_mode = #tpu.pipeline_mode<synchronous>, transform_indices = @transform_4, window_bounds = array<i64: 1, 128>}, {transform_indices = @transform_5, window_bounds = array<i64: 128, 128>}]} {
    %c0 = arith.constant 0 : index
    %c0_0 = arith.constant 0 : index
    %0 = vector.load %arg1[%c0, %c0_0] : memref<128x64xf32, #tpu.memory_space<vmem>>, vector<128x64xf32>
    %1 = arith.truncf %0 : vector<128x64xf32> to vector<128x64xbf16>
    %c0_1 = arith.constant 0 : index
    %c0_2 = arith.constant 0 : index
    %2 = vector.load %arg2[%c0_1, %c0_2] : memref<64x128xbf16, #tpu.memory_space<vmem>>, vector<64x128xbf16>
    %cst = arith.constant dense<0.000000e+00> : vector<128x128xf32>
    %3 = tpu.matmul %1, %2, %cst {dimension_numbers = #tpu.dot_dimension_numbers<[1], [0], [0], [1], [0, 0, 1, 1], [], []>} : vector<128x64xbf16>, vector<64x128xbf16>, vector<128x128xf32> -> vector<128x128xf32>
    %c0_3 = arith.constant 0 : index
    %c0_4 = arith.constant 0 : index
    %4 = vector.load %arg3[%c0_3, %c0_4] : memref<1x128xf32, #tpu.memory_space<vmem>>, vector<1x128xf32>
    %5 = vector.broadcast %4 : vector<1x128xf32> to vector<128x128xf32>
    %6 = arith.addf %3, %5 : vector<128x128xf32>
    %7 = arith.negf %6 : vector<128x128xf32>
    %8 = math.exp %7 : vector<128x128xf32>
    %cst_5 = arith.constant 1.000000e+00 : f32
    %9 = vector.broadcast %cst_5 : f32 to vector<128x128xf32>
    %10 = arith.addf %9, %8 : vector<128x128xf32>
    %11 = arith.divf %9, %10 : vector<128x128xf32>
    %12 = arith.mulf %6, %11 : vector<128x128xf32>
    %13 = arith.truncf %12 : vector<128x128xf32> to vector<128x128xbf16>
    %c0_6 = arith.constant 0 : index
    %c0_7 = arith.constant 0 : index
    %14 = vector.load %arg4[%c0_6, %c0_7] : memref<128x128xbf16, #tpu.memory_space<vmem>>, vector<128x128xbf16>
    %cst_8 = arith.constant dense<0.000000e+00> : vector<128x128xf32>
    %15 = tpu.matmul %13, %14, %cst_8 {dimension_numbers = #tpu.dot_dimension_numbers<[1], [0], [0], [1], [0, 0, 1, 1], [], []>} : vector<128x128xbf16>, vector<128x128xbf16>, vector<128x128xf32> -> vector<128x128xf32>
    %c0_9 = arith.constant 0 : index
    %c0_10 = arith.constant 0 : index
    %16 = vector.load %arg5[%c0_9, %c0_10] : memref<1x128xf32, #tpu.memory_space<vmem>>, vector<1x128xf32>
    %17 = vector.broadcast %16 : vector<1x128xf32> to vector<128x128xf32>
    %18 = arith.addf %15, %17 : vector<128x128xf32>
    %c0_11 = arith.constant 0 : index
    %c0_12 = arith.constant 0 : index
    %19 = vector.load %arg6[%c0_11, %c0_12] : memref<128x128xf32, #tpu.memory_space<vmem>>, vector<128x128xf32>
    tpu.vector_store %arg6[%c0_11, %c0_12], %18 {strides = array<i32>} : memref<128x128xf32, #tpu.memory_space<vmem>>, vector<128x128xf32>,
    return
  }
  func.func @transform_0(%arg0: i32) -> (i32, i32) {
    %c0_i32 = arith.constant 0 : i32
    %c0_i32_0 = arith.constant 0 : i32
    return %arg0, %c0_i32 : i32, i32
  }
  func.func @transform_1(%arg0: i32) -> (i32, i32) {
    %c0_i32 = arith.constant 0 : i32
    %c0_i32_0 = arith.constant 0 : i32
    %c0_i32_1 = arith.constant 0 : i32
    return %c0_i32, %c0_i32_0 : i32, i32
  }
  func.func @transform_2(%arg0: i32) -> (i32, i32) {
    %c0_i32 = arith.constant 0 : i32
    %c0_i32_0 = arith.constant 0 : i32
    %c0_i32_1 = arith.constant 0 : i32
    return %c0_i32, %c0_i32_0 : i32, i32
  }
  func.func @transform_3(%arg0: i32) -> (i32, i32) {
    %c0_i32 = arith.constant 0 : i32
    %c0_i32_0 = arith.constant 0 : i32
    %c0_i32_1 = arith.constant 0 : i32
    return %c0_i32, %c0_i32_0 : i32, i32
  }
  func.func @transform_4(%arg0: i32) -> (i32, i32) {
    %c0_i32 = arith.constant 0 : i32
    %c0_i32_0 = arith.constant 0 : i32
    %c0_i32_1 = arith.constant 0 : i32
    return %c0_i32, %c0_i32_0 : i32, i32
  }
  func.func @transform_5(%arg0: i32) -> (i32, i32) {
    %c0_i32 = arith.constant 0 : i32
    %c0_i32_0 = arith.constant 0 : i32
    return %arg0, %c0_i32 : i32, i32
  }
}

</mosaic_0001>

<bundles_post_ra>
// kernel: _ff_forward_2d.1
= control target key start
LH: loop header
LB: loop body
LE: loop exit
PB: predicated region body
PF: predicated region fallthrough
CT: control target
= control target key end

     0   :  { %vm84_vm0 = vcmask 523264   ;;  %s986_s1 = inlined_call_operand.vmem [shape: bf16[64,128], index: 1, kind: input, shape index: {}]   ;;  %s987_s0 = inlined_call_operand.vmem [shape: f32[128,64], index: 0, kind: input, shape index: {}]   ;;  %s988_s3 = inlined_call_operand.vmem [shape: bf16[128,128], index: 3, kind: input, shape index: {}]   ;;  %s989_s2 = inlined_call_operand.vmem [shape: f32[1,128], index: 2, kind: input, shape index: {}]   ;;  %s990_s4 = inlined_call_operand.vmem [shape: f32[1,128], index: 4, kind: input, shape index: {}]   ;;  %s991_s5 = inlined_call_operand.vmem [shape: f32[128,128], index: 5, kind: output, shape index: {}]  }
   0x1   :  { %v652_v0 = vld [vmem:[%s986_s1] sm:$0xff]   ;;  %v653_v1 = vld [vmem:[%s986_s1 + $0x8] sm:$0xff]   ;;  %v654_v2 = vld [vmem:[%s986_s1 + $0x10] sm:$0xff]  }
   0x2   :  { %580 = vmatprep.subr.bf16.mxu0 %v652_v0  ;;  %v21_v3 = vld [vmem:[%s987_s0] sm:$0xff]  ;;  %v22_v4 = vld [vmem:[%s987_s0 + $0x8] sm:$0xff]  ;;  %v655_v6 = vld [vmem:[%s986_s1 + $0x18] sm:$0xff]  }
   0x3   :  { %581 = vmatpush3.bf16.msra.mxu0 %v652_v0  ;;  %v37_v5 = vpack.c.bf16 %v22_v4, %v21_v3  ;;  %v23_v7 = vld [vmem:[%s987_s0 + $0x10] sm:$0xff]  ;;  %v24_v8 = vld [vmem:[%s987_s0 + $0x18] sm:$0xff]  ;;  %v25_v9 = vld [vmem:[%s987_s0 + $0x20] sm:$0xff] }
   0x4   :  { %582 = vmatprep.subr.bf16.mxu0 %v653_v1  ;;  %v26_v10 = vld [vmem:[%s987_s0 + $0x28] sm:$0xff]  ;;  %v38_v11 = vpack.c.bf16 %v24_v8, %v23_v7  ;;  %v27_v13 = vld [vmem:[%s987_s0 + $0x30] sm:$0xff]  ;;  %v28_v14 = vld [vmem:[%s987_s0 + $0x38] sm:$0xff] }
   0x5   :  { %588 = vmatprep.mubr.msk.bf16.mxu0 %vm84_vm0, %v37_v5  ;;  %v39_v12 = vpack.c.bf16 %v26_v10, %v25_v9  ;;  %v29_v15 = vld [vmem:[%s987_s0 + $0x40] sm:$0xff]  ;;  %v30_v16 = vld [vmem:[%s987_s0 + $0x48] sm:$0xff]  ;;  %v40_v17 = vpack.c.bf16 %v28_v14, %v27_v13  ;;  %v31_v19 = vld [vmem:[%s987_s0 + $0x50] sm:$0xff] }
   0x6   :  { %v41_v18 = vpack.c.bf16 %v30_v16, %v29_v15  ;;  %v32_v20 = vld [vmem:[%s987_s0 + $0x58] sm:$0xff]  ;;  %v33_v21 = vld [vmem:[%s987_s0 + $0x60] sm:$0xff]  ;;  %v34_v22 = vld [vmem:[%s987_s0 + $0x68] sm:$0xff] }
   0x7   :  { %583 = vmatpush3.bf16.msra.mxu0 %v653_v1  ;;  %v42_v23 = vpack.c.bf16 %v32_v20, %v31_v19  ;;  %v43_v24 = vpack.c.bf16 %v34_v22, %v33_v21  ;;  %v35_v25 = vld [vmem:[%s987_s0 + $0x70] sm:$0xff]  ;;  %v36_v26 = vld [vmem:[%s987_s0 + $0x78] sm:$0xff]  ;;  %v656_v28 = vld [vmem:[%s988_s3] sm:$0xff]  }
   0x8   :  { %584 = vmatprep.subr.bf16.mxu0 %v654_v2  ;;  %v44_v27 = vpack.c.bf16 %v36_v26, %v35_v25  ;;  %636 = vmatprep.subr.bf16.mxu1 %v656_v28  ;;  %v657_v29 = vld [vmem:[%s988_s3 + $0x8] sm:$0xff]   ;;  %v658_v30 = vld [vmem:[%s988_s3 + $0x10] sm:$0xff]   ;;  %v659_v31 = vld [vmem:[%s988_s3 + $0x18] sm:$0xff]  }
   0x9   :  { %644 = vmatpush3.bf16.msra.mxu1 %v656_v28  ;;  %v660_v32 = vld [vmem:[%s988_s3 + $0x20] sm:$0xff]   ;;  %v661_v33 = vld [vmem:[%s988_s3 + $0x28] sm:$0xff]   ;;  %v662_v34 = vld [vmem:[%s988_s3 + $0x30] sm:$0xff]  }
   0xa   :  { %637 = vmatprep.subr.bf16.mxu1 %v657_v29  ;;  %v663_v35 = vld [vmem:[%s988_s3 + $0x38] sm:$0xff]   ;;  %v853_v36 = vld [vmem:[%s989_s2] ss:$0 sm:$0xff] }
   0xb   :  { %585 = vmatpush3.bf16.msra.mxu0 %v654_v2 }
   0xc   :  { %586 = vmatprep.subr.bf16.mxu0 %v655_v6 }
   0xd   :  { %645 = vmatpush3.bf16.msra.mxu1 %v657_v29 }
   0xe   :  { %638 = vmatprep.subr.bf16.mxu1 %v658_v30 }
   0xf   :  { %587 = vmatpush3.bf16.msra.mxu0 %v655_v6 }
  0x10   :  { %604 = vmatprep.subr.bf16.mxu0 %v656_v28 }
  0x11   :  { %646 = vmatpush3.bf16.msra.mxu1 %v658_v30 }
  0x12   :  { %589 = vmatmul.mubr.msk.bf16.vlgmr.msra.gmra.mrb[0].mxu0 %vm84_vm0, %v38_v11  ;;  %639 = vmatprep.subr.bf16.mxu1 %v659_v31 }
  0x13   :  { %592 = vmatprep.mubr.msk.bf16.mxu0 %vm84_vm0, %v39_v12  ;;  %605 = vmatpush3.bf16.msra.mxu0 %v656_v28 }
  0x14   :  { %606 = vmatprep.subr.bf16.mxu0 %v657_v29 }
  0x15   :  { %647 = vmatpush3.bf16.msra.mxu1 %v659_v31 }
  0x16   :  { %640 = vmatprep.subr.bf16.mxu1 %v660_v32 }
  0x17   :  { %607 = vmatpush3.bf16.msra.mxu0 %v657_v29 }
  0x18   :  { %608 = vmatprep.subr.bf16.mxu0 %v658_v30 }
  0x19   :  { %648 = vmatpush3.bf16.msra.mxu1 %v660_v32 }
  0x1a   :  { %593 = vmatmul.mubr.msk.bf16.gmra.mrb[4].mxu0 %vm84_vm0, %v40_v17  ;;  %641 = vmatprep.subr.bf16.mxu1 %v661_v33 }
  0x1b   :  { %596 = vmatprep.mubr.msk.bf16.mxu0 %vm84_vm0, %v41_v18  ;;  %609 = vmatpush3.bf16.msra.mxu0 %v658_v30 }
  0x1c   :  { %610 = vmatprep.subr.bf16.mxu0 %v659_v31 }
  0x1d   :  { %649 = vmatpush3.bf16.msra.mxu1 %v661_v33 }
  0x1e   :  { %642 = vmatprep.subr.bf16.mxu1 %v662_v34 }
  0x1f   :  { %611 = vmatpush3.bf16.msra.mxu0 %v659_v31 }
  0x20   :  { %612 = vmatprep.subr.bf16.mxu0 %v660_v32 }
  0x21   :  { %650 = vmatpush3.bf16.msra.mxu1 %v662_v34 }
  0x22   :  { %597 = vmatmul.mubr.msk.bf16.gmra.mrb[8].mxu0 %vm84_vm0, %v42_v23  ;;  %643 = vmatprep.subr.bf16.mxu1 %v663_v35 }
  0x23   :  { %600 = vmatprep.mubr.msk.bf16.mxu0 %vm84_vm0, %v43_v24  ;;  %613 = vmatpush3.bf16.msra.mxu0 %v660_v32 }
  0x24   :  { %614 = vmatprep.subr.bf16.mxu0 %v661_v33 }
  0x25   :  { %651 = vmatpush3.bf16.msra.mxu1 %v663_v35 }
  0x27   :  { %615 = vmatpush3.bf16.msra.mxu0 %v661_v33 }
  0x28   :  { %616 = vmatprep.subr.bf16.mxu0 %v662_v34 }
  0x2a   :  { %601 = vmatmul.mubr.msk.bf16.gmra.mrb[12].mxu0 %vm84_vm0, %v44_v27 }
  0x2b   :  { %617 = vmatpush3.bf16.msra.mxu0 %v662_v34 }
  0x2c   :  { %618 = vmatprep.subr.bf16.mxu0 %v663_v35 }
  0x2f   :  { %619 = vmatpush3.bf16.msra.mxu0 %v663_v35 }
  0xe5   :  { %v590_v37 = vpop.f32.mrb[0].mxu0 }
  0xe6   :  { %v856_v38 = vadd.f32 %v590_v37, %v853_v36  ;;  %v143_v39 = vpop.f32.mrb[1].mxu0 }
  0xe7   :  { %v859_v40 = vadd.f32 %v853_v36, %v143_v39  ;;  %v591_v41 = vpop.f32.mrb[2].mxu0 }
  0xe8   :  { %v529_v42 = vmul.f32 -1.442695, %v856_v38  ;;  %v863_v43 = vadd.f32 %v591_v41, %v853_v36  ;;  %v146_v44 = vpop.f32.mrb[3].mxu0 }
  0xe9   :  { %v527_v45 = vmul.f32 -1.442695, %v859_v40  ;;  %v867_v46 = vadd.f32 %v853_v36, %v146_v44 }
  0xea   :  { %664 = vpow2.f32 %v529_v42  ;;  %v530_v47 = vmul.f32 -1.442695, %v863_v43 }
  0xeb   :  { %666 = vpow2.f32 %v527_v45  ;;  %v528_v48 = vmul.f32 -1.442695, %v867_v46 }
  0xec   :  { %668 = vpow2.f32 %v530_v47 }
  0xed   :  { %670 = vpow2.f32 %v528_v48  ;;  %v594_v49 = vpop.f32.mrb[4].mxu0 }
  0xee   :  { %v872_v50 = vadd.f32 %v594_v49, %v853_v36  ;;  %v159_v51 = vpop.f32.mrb[5].mxu0 }
  0xef   :  { %v875_v52 = vadd.f32 %v853_v36, %v159_v51  ;;  %v595_v53 = vpop.f32.mrb[6].mxu0 }
  0xf0   :  { %v533_v54 = vmul.f32 -1.442695, %v872_v50  ;;  %v879_v55 = vadd.f32 %v595_v53, %v853_v36  ;;  %v162_v56 = vpop.f32.mrb[7].mxu0 }
  0xf1   :  { %v531_v57 = vmul.f32 -1.442695, %v875_v52  ;;  %v883_v58 = vadd.f32 %v853_v36, %v162_v56 }
  0xf2   :  { %672 = vpow2.f32 %v533_v54  ;;  %v534_v59 = vmul.f32 -1.442695, %v879_v55 }
  0xf3   :  { %674 = vpow2.f32 %v531_v57  ;;  %v532_v60 = vmul.f32 -1.442695, %v883_v58 }
  0xf4   :  { %v665_v61 = vpop.eup %664  ;;  %676 = vpow2.f32 %v534_v59 }
  0xf5   :  { %v667_v62 = vpop.eup %666  ;;  %v256_v63 = vadd.f32 1.0, %v665_v61  ;;  %678 = vpow2.f32 %v532_v60  ;;  %v598_v0 = vpop.f32.mrb[8].mxu0 }
  0xf6   :  { %v669_v1 = vpop.eup %668  ;;  %v254_v2 = vadd.f32 1.0, %v667_v62  ;;  %v888_v3 = vadd.f32 %v598_v0, %v853_v36  ;;  %v175_v4 = vpop.f32.mrb[9].mxu0 }
  0xf7   :  { %v671_v5 = vpop.eup %670  ;;  %680 = vrcp.f32 %v256_v63  ;;  %v257_v6 = vadd.f32 1.0, %v669_v1  ;;  %v891_v7 = vadd.f32 %v853_v36, %v175_v4  ;;  %v599_v8 = vpop.f32.mrb[10].mxu0 }
  0xf8   :  { %682 = vrcp.f32 %v254_v2  ;;  %v255_v9 = vadd.f32 1.0, %v671_v5  ;;  %v537_v10 = vmul.f32 -1.442695, %v888_v3  ;;  %v895_v11 = vadd.f32 %v599_v8, %v853_v36  ;;  %v178_v12 = vpop.f32.mrb[11].mxu0 }
  0xf9   :  { %684 = vrcp.f32 %v257_v6  ;;  %v535_v13 = vmul.f32 -1.442695, %v891_v7  ;;  %v899_v14 = vadd.f32 %v853_v36, %v178_v12 }
  0xfa   :  { %686 = vrcp.f32 %v255_v9  ;;  %v538_v15 = vmul.f32 -1.442695, %v895_v11 }
  0xfb   :  { %688 = vpow2.f32 %v537_v10  ;;  %v536_v16 = vmul.f32 -1.442695, %v899_v14 }
  0xfc   :  { %v673_v17 = vpop.eup %672  ;;  %690 = vpow2.f32 %v535_v13 }
  0xfd   :  { %v675_v18 = vpop.eup %674  ;;  %v260_v19 = vadd.f32 1.0, %v673_v17  ;;  %692 = vpow2.f32 %v538_v15  ;;  %v602_v20 = vpop.f32.mrb[12].mxu0 }
  0xfe   :  { %v677_v21 = vpop.eup %676  ;;  %v258_v22 = vadd.f32 1.0, %v675_v18  ;;  %694 = vpow2.f32 %v536_v16  ;;  %v904_v23 = vadd.f32 %v602_v20, %v853_v36  ;;  %v191_v24 = vpop.f32.mrb[13].mxu0 }
  0xff   :  { %v679_v25 = vpop.eup %678  ;;  %696 = vrcp.f32 %v260_v19  ;;  %v261_v26 = vadd.f32 1.0, %v677_v21  ;;  %v907_v27 = vadd.f32 %v853_v36, %v191_v24  ;;  %v603_v28 = vpop.f32.mrb[14].mxu0 }
 0x100   :  { %698 = vrcp.f32 %v258_v22  ;;  %v259_v29 = vadd.f32 1.0, %v679_v25  ;;  %v541_v30 = vmul.f32 -1.442695, %v904_v23  ;;  %v911_v31 = vadd.f32 %v603_v28, %v853_v36  ;;  %v194_v32 = vpop.f32.mrb[15].mxu0 }
 0x101   :  { %v681_v33 = vpop.eup %680  ;;  %700 = vrcp.f32 %v261_v26  ;;  %v539_v34 = vmul.f32 -1.442695, %v907_v27  ;;  %v915_v35 = vadd.f32 %v853_v36, %v194_v32 }
 0x102   :  { %v683_v37 = vpop.eup %682  ;;  %702 = vrcp.f32 %v259_v29  ;;  %v542_v39 = vmul.f32 -1.442695, %v911_v31  ;;  %v304_v45 = vmul.f32 %v681_v33, %v856_v38 }
 0x103   :  { %v685_v41 = vpop.eup %684  ;;  %704 = vpow2.f32 %v541_v30  ;;  %v540_v42 = vmul.f32 -1.442695, %v915_v35  ;;  %v302_v49 = vmul.f32 %v683_v37, %v859_v40 }
 0x104   :  { %v687_v44 = vpop.eup %686  ;;  %v305_v47 = vmul.f32 %v685_v41, %v863_v43  ;;  %706 = vpow2.f32 %v539_v34 }
 0x105   :  { %v689_v48 = vpop.eup %688  ;;  %v303_v36 = vmul.f32 %v687_v44, %v867_v46  ;;  %708 = vpow2.f32 %v542_v39 }
 0x106   :  { %v691_v51 = vpop.eup %690  ;;  %v319_v53 = vpack.c.bf16 %v305_v47, %v304_v45  ;;  %v264_v54 = vadd.f32 1.0, %v689_v48  ;;  %710 = vpow2.f32 %v540_v42 }
 0x107   :  { %v693_v56 = vpop.eup %692  ;;  %v262_v57 = vadd.f32 1.0, %v691_v51  ;;  %v318_v59 = vpack.c.bf16 %v303_v36, %v302_v49 }
 0x108   :  { %v695_v60 = vpop.eup %694  ;;  %712 = vrcp.f32 %v264_v54  ;;  %v265_v61 = vadd.f32 1.0, %v693_v56 }
 0x109   :  { %v697_v38 = vpop.eup %696  ;;  %714 = vrcp.f32 %v262_v57  ;;  %v263_v43 = vadd.f32 1.0, %v695_v60  ;;  %620 = vmatprep.mubr.bf16.mxu0 %v318_v59 }
 0x10a   :  { %v699_v62 = vpop.eup %698  ;;  %716 = vrcp.f32 %v265_v61  ;;  %621 = vmatmul.mubr.bf16.vlgmr.msra.gmra.mrb[16].mxu0 %v319_v53  ;;  %v308_v63 = vmul.f32 %v697_v38, %v872_v50 }
 0x10b   :  { %v701_v40 = vpop.eup %700  ;;  %718 = vrcp.f32 %v263_v43  ;;  %v306_v2 = vmul.f32 %v699_v62, %v875_v52 }
 0x10c   :  { %v703_v46 = vpop.eup %702  ;;  %v309_v0 = vmul.f32 %v701_v40, %v879_v55 }
 0x10d   :  { %v705_v1 = vpop.eup %704  ;;  %v307_v4 = vmul.f32 %v703_v46, %v883_v58 }
 0x10e   :  { %v707_v5 = vpop.eup %706  ;;  %v268_v6 = vadd.f32 1.0, %v705_v1  ;;  %v321_v8 = vpack.c.bf16 %v309_v0, %v308_v63 }
 0x10f   :  { %v709_v9 = vpop.eup %708  ;;  %v266_v10 = vadd.f32 1.0, %v707_v5  ;;  %v320_v12 = vpack.c.bf16 %v307_v4, %v306_v2 }
 0x110   :  { %v711_v13 = vpop.eup %710  ;;  %720 = vrcp.f32 %v268_v6  ;;  %v269_v15 = vadd.f32 1.0, %v709_v9 }
 0x111   :  { %722 = vrcp.f32 %v266_v10  ;;  %v267_v16 = vadd.f32 1.0, %v711_v13  ;;  %624 = vmatprep.mubr.bf16.mxu1 %v320_v12 }
 0x112   :  { %v713_v50 = vpop.eup %712  ;;  %724 = vrcp.f32 %v269_v15  ;;  %625 = vmatmul.mubr.bf16.vlgmr.msra.gmra.mrb[0].mxu1 %v321_v8 }
 0x113   :  { %v715_v55 = vpop.eup %714  ;;  %726 = vrcp.f32 %v267_v16  ;;  %v312_v58 = vmul.f32 %v713_v50, %v888_v3 }
 0x114   :  { %v717_v52 = vpop.eup %716  ;;  %v310_v19 = vmul.f32 %v715_v55, %v891_v7 }
 0x115   :  { %v719_v17 = vpop.eup %718  ;;  %v313_v18 = vmul.f32 %v717_v52, %v895_v11 }
 0x116   :  { %v311_v20 = vmul.f32 %v719_v17, %v899_v14  ;;  %v543_v14 = vld [vmem:[%s990_s4] ss:$0 sm:$0xff] }
 0x117   :  { %v323_v21 = vpack.c.bf16 %v313_v18, %v312_v58 }
 0x118   :  { %v322_v22 = vpack.c.bf16 %v311_v20, %v310_v19 }
 0x11a   :  { %v721_v24 = vpop.eup %720  ;;  %628 = vmatprep.mubr.bf16.mxu1 %v322_v22 }
 0x11b   :  { %v723_v25 = vpop.eup %722  ;;  %629 = vmatmul.mubr.bf16.gmra.mrb[4].mxu1 %v323_v21  ;;  %v316_v29 = vmul.f32 %v721_v24, %v904_v23 }
 0x11c   :  { %v725_v26 = vpop.eup %724  ;;  %v314_v3 = vmul.f32 %v723_v25, %v907_v27 }
 0x11d   :  { %v727_v28 = vpop.eup %726  ;;  %v317_v30 = vmul.f32 %v725_v26, %v911_v31 }
 0x11e   :  { %v315_v11 = vmul.f32 %v727_v28, %v915_v35 }
 0x11f   :  { %v325_v32 = vpack.c.bf16 %v317_v30, %v316_v29 }
 0x120   :  { %v324_v7 = vpack.c.bf16 %v315_v11, %v314_v3 }
 0x122   :  { %632 = vmatprep.mubr.bf16.mxu1 %v324_v7 }
 0x123   :  { %633 = vmatmul.mubr.bf16.gmra.mrb[8].mxu1 %v325_v32 }
 0x1dd   :  { %v622_v33 = vpop.f32.mrb[16].mxu0 }
 0x1de   :  { %v440_v34 = vadd.f32 %v622_v33, %v543_v14  ;;  %v431_v37 = vpop.f32.mrb[17].mxu0 }
 0x1df   :  { %v432_v39 = vadd.f32 %v543_v14, %v431_v37  ;;  %v623_v41 = vpop.f32.mrb[18].mxu0 }
 0x1e0   :  { %496 = vst [vmem:[%s991_s5 + $0x10] sm:$0xff] %v440_v34  ;;  %v443_v23 = vadd.f32 %v623_v41, %v543_v14  ;;  %v434_v27 = vpop.f32.mrb[19].mxu0 }
 0x1e1   :  { %494 = vst [vmem:[%s991_s5] sm:$0xff] %v432_v39  ;;  %v435_v31 = vadd.f32 %v543_v14, %v434_v27 }
 0x1e2   :  { %497 = vst [vmem:[%s991_s5 + $0x18] sm:$0xff] %v443_v23 }
 0x1e3   :  { %495 = vst [vmem:[%s991_s5 + $0x8] sm:$0xff] %v435_v31 }
 0x1e5   :  { %v626_v35 = vpop.f32.mrb[0].mxu1 }
 0x1e6   :  { %v456_v42 = vadd.f32 %v626_v35, %v543_v14  ;;  %v447_v44 = vpop.f32.mrb[1].mxu1 }
 0x1e7   :  { %v448_v45 = vadd.f32 %v543_v14, %v447_v44  ;;  %v627_v47 = vpop.f32.mrb[2].mxu1 }
 0x1e8   :  { %500 = vst [vmem:[%s991_s5 + $0x30] sm:$0xff] %v456_v42  ;;  %v459_v48 = vadd.f32 %v627_v47, %v543_v14  ;;  %v450_v49 = vpop.f32.mrb[3].mxu1 }
 0x1e9   :  { %498 = vst [vmem:[%s991_s5 + $0x20] sm:$0xff] %v448_v45  ;;  %v451_v36 = vadd.f32 %v543_v14, %v450_v49 }
 0x1ea   :  { %501 = vst [vmem:[%s991_s5 + $0x38] sm:$0xff] %v459_v48 }
 0x1eb   :  { %499 = vst [vmem:[%s991_s5 + $0x28] sm:$0xff] %v451_v36 }
 0x1ee   :  { %v630_v51 = vpop.f32.mrb[4].mxu1 }
 0x1ef   :  { %v472_v53 = vadd.f32 %v630_v51, %v543_v14  ;;  %v463_v54 = vpop.f32.mrb[5].mxu1 }
 0x1f0   :  { %v464_v56 = vadd.f32 %v543_v14, %v463_v54  ;;  %v631_v57 = vpop.f32.mrb[6].mxu1 }
 0x1f1   :  { %504 = vst [vmem:[%s991_s5 + $0x50] sm:$0xff] %v472_v53  ;;  %v475_v59 = vadd.f32 %v631_v57, %v543_v14  ;;  %v466_v60 = vpop.f32.mrb[7].mxu1 }
 0x1f2   :  { %502 = vst [vmem:[%s991_s5 + $0x40] sm:$0xff] %v464_v56  ;;  %v467_v61 = vadd.f32 %v543_v14, %v466_v60 }
 0x1f3   :  { %505 = vst [vmem:[%s991_s5 + $0x58] sm:$0xff] %v475_v59 }
 0x1f4   :  { %503 = vst [vmem:[%s991_s5 + $0x48] sm:$0xff] %v467_v61 }
 0x1f6   :  { %v634_v38 = vpop.f32.mrb[8].mxu1 }
 0x1f7   :  { %v488_v43 = vadd.f32 %v634_v38, %v543_v14  ;;  %v479_v62 = vpop.f32.mrb[9].mxu1 }
 0x1f8   :  { %v480_v40 = vadd.f32 %v543_v14, %v479_v62  ;;  %v635_v46 = vpop.f32.mrb[10].mxu1 }
 0x1f9   :  { %508 = vst [vmem:[%s991_s5 + $0x70] sm:$0xff] %v488_v43  ;;  %v491_v63 = vadd.f32 %v635_v46, %v543_v14  ;;  %v482_v0 = vpop.f32.mrb[11].mxu1 }
 0x1fa   :  { %506 = vst [vmem:[%s991_s5 + $0x60] sm:$0xff] %v480_v40  ;;  %v483_v1 = vadd.f32 %v543_v14, %v482_v0 }
 0x1fb   :  { %509 = vst [vmem:[%s991_s5 + $0x78] sm:$0xff] %v491_v63 }
 0x1fc   :  { %507 = vst [vmem:[%s991_s5 + $0x68] sm:$0xff] %v483_v1 }

</bundles_post_ra>
